<compile_context>
chip_gen: v7x
topology: tpu7x:2x2x1
jax: 0.10.0
libtpu: 0.0.40
codegen_flags: <defaults>
</compile_context>

<pallas_src>
import jax
import jax.numpy as jnp
from jax.experimental import pallas as pl
from jax.experimental.pallas import tpu as pltpu


def pen1_max_kernel(x_ref, w_ref, b_ref, o_ref):
    # x_ref: (TB, N, Din) f32   w_ref: (Din, Dout) f32
    # b_ref: (1, Dout)    f32   o_ref: (TB, N, Dout)
    TB, N, Din = x_ref.shape
    Dout = w_ref.shape[1]

    x = x_ref[...]                                    # (TB, N, Din) f32
    xm = jnp.max(x, axis=1)                           # (TB, Din) -- max over set axis

    # Cast only at the MXU inputs; accumulate in f32.
    w_bf16 = w_ref[...].astype(jnp.bfloat16)
    x_bf16 = x.reshape(TB * N, Din).astype(jnp.bfloat16)

    # One large MXU matmul covering all TB*N rows of this tile.
    y = jnp.dot(x_bf16, w_bf16,
                preferred_element_type=jnp.float32)   # (TB*N, Dout) f32
    # Tiny correction matmul: xm @ W -> (TB, Dout).
    ym = jnp.dot(xm.astype(jnp.bfloat16), w_bf16,
                 preferred_element_type=jnp.float32)

    out = y.reshape(TB, N, Dout) - ym[:, None, :] + b_ref[...]   # f32 VPU
    o_ref[...] = out.astype(o_ref.dtype)


def _pick_batch_tile(B, N, Din, Dout, *, target_rows=512,
                     tile_budget_bytes=12 * 1024 * 1024):
    """Largest TB dividing B whose double-buffered x/out tiles fit the budget
    (sized for v7x's smaller 64 MiB VMEM), preferring TB*N >= target_rows so
    the MXU M dimension is well filled (>=128 v5e, >=256 v6e/v7x)."""
    best = 1
    for tb in range(1, B + 1):
        if B % tb:
            continue
        rows = tb * N
        tile_bytes = 2 * rows * (Din + Dout) * 4      # double-buffered x + out, f32
        if tile_bytes > tile_budget_bytes:
            break
        best = tb
        if rows >= target_rows:
            break
    return best


def pen1_max(x, w, b):
    """x: (B, N, Din) f32; w: (Din, Dout) f32; b: (Dout,) f32 -> (B, N, Dout)."""
    B, N, Din = x.shape
    Dout = w.shape[1]
    b2 = b.reshape(1, Dout)

    TB = _pick_batch_tile(B, N, Din, Dout)
    grid = (B // TB,)

    x_tile_bytes = TB * N * Din * 4
    o_tile_bytes = TB * N * Dout * 4
    w_bytes = Din * Dout * 4
    b_bytes = Dout * 4

    # W and b are constant across the grid.  For non-toy sizes, single-buffer
    # them so they don't pay for a duplicate pipeline copy in VMEM.
    if w_bytes >= (1 << 20):
        w_spec = pl.BlockSpec((Din, Dout), lambda i: (0, 0),
                              pipeline_mode=pl.Buffered(1))
        b_spec = pl.BlockSpec((1, Dout), lambda i: (0, 0),
                              pipeline_mode=pl.Buffered(1))
    else:
        w_spec = pl.BlockSpec((Din, Dout), lambda i: (0, 0))
        b_spec = pl.BlockSpec((1, Dout), lambda i: (0, 0))

    # Raise the scoped-VMEM limit only when large tiles need it
    # (v6e default scoped limit is 32 MiB of 128 MiB physical).
    vmem_needed = 2 * (x_tile_bytes + o_tile_bytes) + w_bytes + b_bytes + (2 << 20)
    cp_kwargs = dict(dimension_semantics=("parallel",))
    if vmem_needed > 32 * 1024 * 1024:
        cp_kwargs["vmem_limit_bytes"] = min(vmem_needed, 100 * 1024 * 1024)

    cost = pl.CostEstimate(
        flops=2 * B * N * Din * Dout + 2 * B * Din * Dout,
        transcendentals=0,
        bytes_accessed=(B * N * Din * 4) + w_bytes + b_bytes + (B * N * Dout * 4),
    )

    return pl.pallas_call(
        pen1_max_kernel,
        out_shape=jax.ShapeDtypeStruct((B, N, Dout), x.dtype),
        grid_spec=pltpu.PrefetchScalarGridSpec(
            num_scalar_prefetch=0,
            grid=grid,
            in_specs=[
                pl.BlockSpec((TB, N, Din), lambda i: (i, 0, 0)),
                w_spec,
                b_spec,
            ],
            out_specs=pl.BlockSpec((TB, N, Dout), lambda i: (i, 0, 0)),
        ),
        compiler_params=pltpu.CompilerParams(**cp_kwargs),
        cost_estimate=cost,
    )(x, w, b2)


if __name__ == "__main__":
    # Small shapes consistent with the module: batch=2, set size=8,
    # in_dim=32, out_dim=16.
    B, N, Din, Dout = 2, 8, 32, 16

    key = jax.random.PRNGKey(0)
    kx, kw, kb = jax.random.split(key, 3)

    x = jax.random.normal(kx, (B, N, Din), dtype=jnp.float32)
    # Synthetic nn.Linear(in_dim, out_dim) params; torch weight is
    # (out_dim, in_dim) — we store its transpose (Din, Dout).
    bound = 1.0 / (Din ** 0.5)
    w = jax.random.uniform(kw, (Din, Dout), minval=-bound, maxval=bound,
                           dtype=jnp.float32)
    bias = jax.random.uniform(kb, (Dout,), minval=-bound, maxval=bound,
                              dtype=jnp.float32)

    out = pen1_max(x, w, bias)
    out = jax.block_until_ready(out)

    # Reference in plain JAX (matches the PyTorch forward).  Tolerance is
    # relaxed because the kernel feeds the MXU in bf16 (f32 accumulate).
    xm = jnp.max(x, axis=1, keepdims=True)
    ref = (x - xm) @ w + bias
    assert jnp.allclose(out, ref, atol=3e-2, rtol=2e-2), "mismatch vs reference"

    print("KERNEL_OK")
</pallas_src>

<mosaic_0001>
module attributes {stable_mosaic.version = 11 : i64} {
  func.func @pen1_max_kernel(%arg0: i32, %arg1: memref<2x8x32xf32, #tpu.memory_space<vmem>>, %arg2: memref<32x16xf32, #tpu.memory_space<vmem>>, %arg3: memref<1x16xf32, #tpu.memory_space<vmem>>, %arg4: memref<2x8x16xf32, #tpu.memory_space<vmem>>) attributes {dimension_semantics = [#tpu.dimension_semantics<parallel>], iteration_bounds = array<i64: 1>, scalar_prefetch = 0 : i64, scratch_operands = 0 : i64, tpu.core_type = #tpu.core_type<tc>, window_params = [{transform_indices = @transform_0, window_bounds = array<i64: 2, 8, 32>}, {pipeline_mode = #tpu.pipeline_mode<synchronous>, transform_indices = @transform_1, window_bounds = array<i64: 32, 16>}, {pipeline_mode = #tpu.pipeline_mode<synchronous>, transform_indices = @transform_2, window_bounds = array<i64: 1, 16>}, {transform_indices = @transform_3, window_bounds = array<i64: 2, 8, 16>}]} {
    %c0 = arith.constant 0 : index
    %c0_0 = arith.constant 0 : index
    %c0_1 = arith.constant 0 : index
    %0 = vector.load %arg1[%c0, %c0_0, %c0_1] : memref<2x8x32xf32, #tpu.memory_space<vmem>>, vector<2x8x32xf32>
    %cst = arith.constant dense<0xFF800000> : vector<2x32xf32>
    %1 = vector.multi_reduction <maximumf>, %0, %cst [1] : vector<2x8x32xf32> to vector<2x32xf32>
    %c0_2 = arith.constant 0 : index
    %c0_3 = arith.constant 0 : index
    %2 = vector.load %arg2[%c0_2, %c0_3] : memref<32x16xf32, #tpu.memory_space<vmem>>, vector<32x16xf32>
    %3 = arith.truncf %2 : vector<32x16xf32> to vector<32x16xbf16>
    %4 = vector.shape_cast %0 : vector<2x8x32xf32> to vector<16x32xf32>
    %5 = arith.truncf %4 : vector<16x32xf32> to vector<16x32xbf16>
    %cst_4 = arith.constant dense<0.000000e+00> : vector<16x16xf32>
    %6 = tpu.matmul %5, %3, %cst_4 {dimension_numbers = #tpu.dot_dimension_numbers<[1], [0], [0], [1], [0, 0, 1, 1], [], []>} : vector<16x32xbf16>, vector<32x16xbf16>, vector<16x16xf32> -> vector<16x16xf32>
    %7 = arith.truncf %1 : vector<2x32xf32> to vector<2x32xbf16>
    %cst_5 = arith.constant dense<0.000000e+00> : vector<2x16xf32>
    %8 = tpu.matmul %7, %3, %cst_5 {dimension_numbers = #tpu.dot_dimension_numbers<[1], [0], [0], [1], [0, 0, 1, 1], [], []>} : vector<2x32xbf16>, vector<32x16xbf16>, vector<2x16xf32> -> vector<2x16xf32>
    %9 = vector.shape_cast %6 : vector<16x16xf32> to vector<2x8x16xf32>
    %10 = vector.shape_cast %8 : vector<2x16xf32> to vector<2x1x16xf32>
    %11 = vector.broadcast %10 : vector<2x1x16xf32> to vector<2x8x16xf32>
    %12 = arith.subf %9, %11 : vector<2x8x16xf32>
    %c0_6 = arith.constant 0 : index
    %c0_7 = arith.constant 0 : index
    %13 = vector.load %arg3[%c0_6, %c0_7] : memref<1x16xf32, #tpu.memory_space<vmem>>, vector<1x16xf32>
    %14 = vector.shape_cast %13 : vector<1x16xf32> to vector<1x1x16xf32>
    %15 = vector.broadcast %14 : vector<1x1x16xf32> to vector<2x8x16xf32>
    %16 = arith.addf %12, %15 : vector<2x8x16xf32>
    %c0_8 = arith.constant 0 : index
    %c0_9 = arith.constant 0 : index
    %c0_10 = arith.constant 0 : index
    %17 = vector.load %arg4[%c0_8, %c0_9, %c0_10] : memref<2x8x16xf32, #tpu.memory_space<vmem>>, vector<2x8x16xf32>
    tpu.vector_store %arg4[%c0_8, %c0_9, %c0_10], %16 {strides = array<i32>} : memref<2x8x16xf32, #tpu.memory_space<vmem>>, vector<2x8x16xf32>,
    return
  }
  func.func @transform_0(%arg0: i32) -> (i32, i32, i32) {
    %c0_i32 = arith.constant 0 : i32
    %c0_i32_0 = arith.constant 0 : i32
    %c0_i32_1 = arith.constant 0 : i32
    return %arg0, %c0_i32, %c0_i32_0 : i32, i32, i32
  }
  func.func @transform_1(%arg0: i32) -> (i32, i32) {
    %c0_i32 = arith.constant 0 : i32
    %c0_i32_0 = arith.constant 0 : i32
    %c0_i32_1 = arith.constant 0 : i32
    return %c0_i32, %c0_i32_0 : i32, i32
  }
  func.func @transform_2(%arg0: i32) -> (i32, i32) {
    %c0_i32 = arith.constant 0 : i32
    %c0_i32_0 = arith.constant 0 : i32
    %c0_i32_1 = arith.constant 0 : i32
    return %c0_i32, %c0_i32_0 : i32, i32
  }
  func.func @transform_3(%arg0: i32) -> (i32, i32, i32) {
    %c0_i32 = arith.constant 0 : i32
    %c0_i32_0 = arith.constant 0 : i32
    %c0_i32_1 = arith.constant 0 : i32
    return %arg0, %c0_i32, %c0_i32_0 : i32, i32, i32
  }
}

</mosaic_0001>

<bundles_post_ra>
// kernel: tpu_custom_call.1
= control target key start
LH: loop header
LB: loop body
LE: loop exit
PB: predicated region body
PF: predicated region fallthrough
CT: control target
= control target key end

     0   :  { %vm18_vm0 = vcmask 261120   ;;  %v254_v3 = vmov 0.0   ;;  %vm255_vm1 = vmmov 0   ;;  %s317_s0 = inlined_call_operand.vmem [shape: f32[2,8,32], index: 0, kind: input, shape index: {}]   ;;  %s318_s1 = inlined_call_operand.vmem [shape: f32[32,16], index: 1, kind: input, shape index: {}]   ;;  %s319_s2 = inlined_call_operand.vmem [shape: f32[1,16], index: 2, kind: input, shape index: {}]   ;;  %s320_s3 = inlined_call_operand.hbm [shape: f32[2,8,16], index: 3, kind: output, shape index: {}]  }
   0x1   :  { %v33_v0 = vld [vmem:[%s318_s1] sm:$0xff]  ;;  %v34_v1 = vld [vmem:[%s318_s1 + $0x8] sm:$0xff]  ;;  %v35_v2 = vld [vmem:[%s318_s1 + $0x10] sm:$0xff]  ;;  %216 = vmatprep.subr.bf16.mxu1 %v254_v3  ;;  %208 = vmatprep.subr.bf16.mxu0 %v254_v3 }
   0x2   :  { %v37_v4 = vpack.c.bf16 %v34_v1, %v33_v0  ;;  %v36_v5 = vld [vmem:[%s318_s1 + $0x18] sm:$0xff]  ;;  %v16_v6 = vld [vmem:[%s317_s0] sm:$0xff]  ;;  %v17_v7 = vld [vmem:[%s317_s0 + $0x8] sm:$0xff]  ;;  %220 = vmatprep.mubr.msk.bf16.mxu1 %vm255_vm1, %v254_v3  ;;  %212 = vmatprep.mubr.msk.bf16.mxu0 %vm255_vm1, %v254_v3 }
   0x3   :  { %v19_v8 = vsel %vm18_vm0, %v16_v6, -inf  ;;  %v26_v9 = vsel %vm18_vm0, %v17_v7, -inf }
   0x4   :  { %8 = vsyncpa [#allocation3], 0  ;;  %217 = vmatpush3.bf16.msra.mxu1 %v37_v4  ;;  %209 = vmatpush3.bf16.msra.mxu0 %v37_v4  ;;  %v38_v10 = vpack.c.bf16 %v36_v5, %v35_v2  ;;  %v20_v11 = vrot.slane %v19_v8, 4  ;;  %v27_v12 = vrot.slane %v26_v9, 4  ;;  %v39_v15 = vpack.c.bf16 %v17_v7, %v16_v6  ;;  %v201_v50 = vld [vmem:[%s319_s2] ss:$0 sm:$0xff] }
   0x5   :  { %218 = vmatprep.subr.bf16.mxu1 %v254_v3  ;;  %210 = vmatprep.subr.bf16.mxu0 %v254_v3  ;;  %vm90_vm2 = vcmask 1041409   ;;  %v256_v31 = vmov 1966171168   ;;  %v140_v33 = vlaneseq  ;;  %s257_s24 = smov [#allocation2]   ;;  %vm180_vm3 = vcmask 130048  }
   0x6   :  { %v21_v13 = vmax.f32 %v19_v8, %v20_v11  ;;  %v28_v14 = vmax.f32 %v26_v9, %v27_v12  ;;  %v138_v32 = vunpack.c.l.s4 %v256_v31  ;;  %s188_s25 = sshll.u32 %s257_s24, 4  ;;  %s189_s25 = int_to_ptr.vmem [resolvable:$true] %s188_s25 }
   0x7   :  { %v141_v38 = vshrl.u32 %v140_v33, 7  ;;  %s230_s26 = scalar_lea.vmem %s189_s25, 256  ;;  %p235_p1 = scmp.lt.s32.totalorder %s189_s25, %s189_s25 }
   0x8   :  { %219 = vmatpush3.bf16.msra.mxu1 %v38_v10  ;;  %211 = vmatpush3.bf16.msra.mxu0 %v38_v10  ;;  %v22_v16 = vrot.slane %v21_v13, 2  ;;  %v29_v17 = vrot.slane %v28_v14, 2  ;;  %v139_v37 = vunpack.c.0.s8 %v138_v32  ;;  %p231_p0 = scmp.ne.s32.totalorder %s189_s25, %s230_s26  ;;  %p236_p2 = scmp.lt.s32.totalorder %s230_s26, %s230_s26 }
   0x9   :  { %v161_v43 = vsub.s32 0, %v141_v38 }
   0xa   :  { %v23_v18 = vmax.f32 %v21_v13, %v22_v16  ;;  %v30_v19 = vmax.f32 %v28_v14, %v29_v17  ;;  %v142_v39 = vsub.s32 %v139_v37, %v141_v38  ;;  %p237_p3 = por %p236_p2, %p235_p1 }
   0xb   :  { %213 = vmatmul.mubr.msk.bf16.vlgmr.msra.gmra.mrb[0].mxu0 %vm18_vm0, %v39_v15 }
   0xc   :  { %v24_v20 = vrot.slane %v23_v18, 1  ;;  %v31_v21 = vrot.slane %v30_v19, 1  ;;  %p238_p4 = pnand %p237_p3, %p231_p0 }
   0xe   :  { %v25_v22 = vmax.f32 %v23_v18, %v24_v20  ;;  %v32_v23 = vmax.f32 %v30_v19, %v31_v21 }
  0x10   :  { %v84_v24 = vpack.c.bf16 %v25_v22, %v25_v22  ;;  %v85_v25 = vpack.c.bf16 %v32_v23, %v32_v23 }
  0x12   :  { %v88_v26 = vunpack.c.l.b16 %v84_v24  ;;  %v89_v27 = vunpack.c.l.b16 %v85_v25 }
  0x14   :  { %v91_v28 = vsel %vm90_vm2, %v89_v27, %v88_v26 }
  0x15   :  { %v92_v29 = vpack.c.b16 %v91_v28, %v91_v28 }
  0x17   :  { %221 = vmatmul.mubr.msk.bf16.vlgmr.msra.gmra.mrb[0].mxu1 %vm18_vm0, %v92_v29 }
  0xde   :  { %v77_v30 = vpop.f32.mrb[0].mxu0 }
  0xdf   :  { %v214_v34 = vpop.f32.mrb[1].mxu0 }
  0xe0   :  { %v80_v35 = vpop.f32.mrb[2].mxu0 }
  0xe1   :  { %v215_v36 = vpop.f32.mrb[3].mxu0 }
  0xea   :  { %v130_v40 = vpop.f32.mrb[0].mxu1 }
  0xeb   :  { %v143_v41 = vrot.slane %v130_v40, %v142_v39  ;;  %v222_v42 = vpop.f32.mrb[1].mxu1 }
  0xec   :  { %v133_v44 = vpop.f32.mrb[2].mxu1 }
  0xed   :  { %v144_v45 = vcombine.high %v143_v41, %v143_v41  ;;  %v151_v46 = vrot.slane %v143_v41, %v142_v39  ;;  %v223_v47 = vpop.f32.mrb[3].mxu1 }
  0xef   :  { %v162_v48 = vrot.slane %v151_v46, %v161_v43  ;;  %v158_v49 = vrot.slane %v144_v45, %v142_v39 }
  0xf1   :  { %v169_v51 = vsub.f32 %v77_v30, %v162_v48  ;;  %v166_v52 = vrot.slane %v158_v49, %v161_v43 }
  0xf3   :  { %v178_v53 = vadd.f32 %v201_v50, %v169_v51  ;;  %v170_v54 = vsub.f32 %v80_v35, %v166_v52 }
  0xf5   :  { %181 = vst.msk [vmem:[#allocation2] sm:$0xff] %vm180_vm3, %v178_v53  ;;  %v179_v55 = vadd.f32 %v201_v50, %v170_v54 }
  0xf7   :  { %182 = vst.msk [vmem:[#allocation2 + $0x8] sm:$0xff] %vm180_vm3, %v179_v55 }
  0xf8   :  { %241 = shalt.err (!%p238_p4)
}
  0xf9   :  { %s242_s28 = scalar_lea.hbm %s320_s3, 256 }
  0xfa   :  { %p243_p5 = scmp.ne.s32.totalorder %s320_s3, %s242_s28  ;;  %p246_p6 = scmp.lt.u32.totalorder %s242_s28, %s320_s3 }
  0xfc   :  { %p248_p7 = pnand %p246_p6, %p243_p5 }
  0xfe   :  { %251 = shalt.err (!%p248_p7)
}
  0xff   :  { %s258_s6 = smov 128   ;;  %s259_s7 = smov 8  }
 0x100   :  { %194 = dma.vmem_to_hbm [thread:$0]  %s189_s25, 256, %s320_s3, [#allocation3], %s258_s6, %s258_s6, %s259_s7  }
 0x101   :  { %252 = dma.done.wait [#allocation3], 256  }
 0x102   :  { %253 = vsyncadd [#allocation3], 4294967040 }
 0x103   :  { %198 = vsyncpa [#allocation3], 1 }

</bundles_post_ra>
